<compile_context>
chip_gen: v7x
topology: tpu7x:2x2x1
jax: 0.10.0
libtpu: 0.0.40
codegen_flags: <defaults>
</compile_context>

<pallas_src>
import math
import functools

import jax
import jax.numpy as jnp
from jax import lax
from jax.experimental import pallas as pl
from jax.experimental.pallas import tpu as pltpu


def _gd_attention_kernel(x_ref, wq_ref, wk_ref, wot_ref, o_ref, *, n_head, d_embed):
    # One grid step = one batch element; heads are folded into the lane dimension.
    x = x_ref[0]                                   # (S, D), native dtype
    s_len = x.shape[0]
    scale = 1.0 / math.sqrt(d_embed)

    # Head-batched projections: two lane-dense (S, D) @ (D, H*D) MXU calls.
    q_all = jnp.dot(x, wq_ref[...], preferred_element_type=jnp.float32)   # (S, H*D)
    k_all = jnp.dot(x, wk_ref[...], preferred_element_type=jnp.float32)   # (S, H*D)

    # Causal mask built once, reused for every head.
    row = lax.broadcasted_iota(jnp.int32, (s_len, s_len), 0)
    col = lax.broadcasted_iota(jnp.int32, (s_len, s_len), 1)
    causal = col <= row

    # Per-head attention (H is small -> static unrolled loop). V = x.
    ys = []
    for h in range(n_head):
        q_h = q_all[:, h * d_embed:(h + 1) * d_embed]          # (S, D) f32
        k_h = k_all[:, h * d_embed:(h + 1) * d_embed]          # (S, D) f32
        scores = lax.dot_general(                               # q_h @ k_h^T -> (S, S)
            q_h, k_h, (((1,), (1,)), ((), ())),
            preferred_element_type=jnp.float32)
        scores = jnp.clip(scores * scale, -10.0, 10.0)
        scores = jnp.where(causal, scores, -jnp.inf)            # diag unmasked: no NaN rows
        m = jnp.max(scores, axis=-1, keepdims=True)
        p = jnp.exp(scores - m)
        denom = jnp.sum(p, axis=-1, keepdims=True)
        attn = p * pl.reciprocal(denom, approx=True)            # EUP slot
        ys.append(jnp.dot(attn.astype(x.dtype), x,
                          preferred_element_type=jnp.float32))  # (S, D)

    # Head-major concat along lanes -> (S, H*D), then one fused output projection.
    y_flat = jnp.concatenate(ys, axis=-1)                       # (S, H*D) f32
    out = jnp.dot(y_flat.astype(wot_ref.dtype), wot_ref[...],
                  preferred_element_type=jnp.float32)           # (S, D)
    o_ref[0] = out.astype(o_ref.dtype)


def gd_attention(x, W_q, W_k, W_o):
    """x: (B, S, D); W_q/W_k: (H, D, D); W_o: (D, H*D).  Returns (B, S, D)."""
    B, S, D = x.shape
    H = W_q.shape[0]
    assert W_o.shape == (D, H * D)

    # Flatten head weights into the lane dimension (done once, outside the kernel):
    #   wq_flat[d, h*D + e] = W_q[h, d, e]   (same for W_k)
    #   wot_flat            = W_o.T  (H*D, D), matching the head-major concat order.
    wq_flat = jnp.transpose(W_q, (1, 0, 2)).reshape(D, H * D)
    wk_flat = jnp.transpose(W_k, (1, 0, 2)).reshape(D, H * D)
    wot_flat = W_o.T

    kernel = functools.partial(_gd_attention_kernel, n_head=H, d_embed=D)

    return pl.pallas_call(
        kernel,
        out_shape=jax.ShapeDtypeStruct((B, S, D), x.dtype),
        grid_spec=pltpu.PrefetchScalarGridSpec(
            num_scalar_prefetch=0,
            grid=(B,),
            in_specs=[
                pl.BlockSpec((1, S, D), lambda b: (b, 0, 0)),    # x (per batch)
                pl.BlockSpec((D, H * D), lambda b: (0, 0)),      # W_q flat (resident)
                pl.BlockSpec((D, H * D), lambda b: (0, 0)),      # W_k flat (resident)
                pl.BlockSpec((H * D, D), lambda b: (0, 0)),      # W_o^T flat (resident)
            ],
            out_specs=pl.BlockSpec((1, S, D), lambda b: (b, 0, 0)),
        ),
        compiler_params=pltpu.CompilerParams(
            dimension_semantics=("parallel",),                   # B >= 2 -> both TCs on v7x
        ),
    )(x, wq_flat, wk_flat, wot_flat)


def _reference(x, W_q, W_k, W_o):
    """Plain-JAX reference mirroring the (intended) PyTorch forward."""
    B, S, D = x.shape
    H = W_q.shape[0]
    xh = jnp.broadcast_to(x[:, None, :, :], (B, H, S, D))          # (B,H,S,D)
    Q = jnp.einsum("bhsd,hde->bhse", xh, W_q)
    K = jnp.einsum("bhsd,hde->bhse", xh, W_k)
    scores = jnp.einsum("bhse,bhte->bhst", Q, K) / math.sqrt(D)
    scores = jnp.clip(scores, -10.0, 10.0)
    mask = jnp.tril(jnp.ones((S, S), dtype=bool))
    scores = jnp.where(mask[None, None], scores, -jnp.inf)
    attn = jax.nn.softmax(scores, axis=-1)
    y = jnp.einsum("bhst,bhtd->bhsd", attn, xh)                     # (B,H,S,D)
    y = jnp.transpose(y, (0, 2, 1, 3)).reshape(B, S, H * D)
    return y @ W_o.T


if __name__ == "__main__":
    # Config: n_head=4, d_embed=32, n_layer=2, dropout=0.0; B=2, S=8
    B, S, D, H, n_layer = 2, 8, 32, 4, 2

    key = jax.random.PRNGKey(0)
    kx, kq, kk, ko = jax.random.split(key, 4)

    x = jax.random.normal(kx, (B, S, D), dtype=jnp.float32)
    W_q = 0.02 * jax.random.normal(kq, (H, D, D), dtype=jnp.float32)
    W_k = 0.02 * jax.random.normal(kk, (H, D, D), dtype=jnp.float32)
    W_o = (0.02 / math.sqrt(2 * n_layer)) * jax.random.normal(
        ko, (D, H * D), dtype=jnp.float32
    )

    out = gd_attention(x, W_q, W_k, W_o)
    out = jax.block_until_ready(out)

    ref = _reference(x, W_q, W_k, W_o)
    assert out.shape == (B, S, D)
    # Tolerance loosened slightly for the approx (EUP) softmax reciprocal.
    assert jnp.allclose(out, ref, atol=1e-3, rtol=1e-3), "mismatch vs reference"

    print("KERNEL_OK")
</pallas_src>

<mosaic_0001>
module attributes {stable_mosaic.version = 11 : i64} {
  func.func @_gd_attention_kernel(%arg0: i32, %arg1: memref<1x8x32xf32, #tpu.memory_space<vmem>>, %arg2: memref<32x128xf32, #tpu.memory_space<vmem>>, %arg3: memref<32x128xf32, #tpu.memory_space<vmem>>, %arg4: memref<128x32xf32, #tpu.memory_space<vmem>>, %arg5: memref<1x8x32xf32, #tpu.memory_space<vmem>>) attributes {dimension_semantics = [#tpu.dimension_semantics<parallel>], iteration_bounds = array<i64: 2>, scalar_prefetch = 0 : i64, scratch_operands = 0 : i64, tpu.core_type = #tpu.core_type<tc>, window_params = [{transform_indices = @transform_0, window_bounds = array<i64: 1, 8, 32>}, {pipeline_mode = #tpu.pipeline_mode<synchronous>, transform_indices = @transform_1, window_bounds = array<i64: 32, 128>}, {pipeline_mode = #tpu.pipeline_mode<synchronous>, transform_indices = @transform_2, window_bounds = array<i64: 32, 128>}, {pipeline_mode = #tpu.pipeline_mode<synchronous>, transform_indices = @transform_3, window_bounds = array<i64: 128, 32>}, {transform_indices = @transform_4, window_bounds = array<i64: 1, 8, 32>}]} {
    %c0 = arith.constant 0 : index
    %c0_0 = arith.constant 0 : index
    %c0_1 = arith.constant 0 : index
    %0 = vector.load %arg1[%c0, %c0_0, %c0_1] : memref<1x8x32xf32, #tpu.memory_space<vmem>>, vector<1x8x32xf32>
    %1 = vector.shape_cast %0 : vector<1x8x32xf32> to vector<8x32xf32>
    %c0_2 = arith.constant 0 : index
    %c0_3 = arith.constant 0 : index
    %2 = vector.load %arg2[%c0_2, %c0_3] : memref<32x128xf32, #tpu.memory_space<vmem>>, vector<32x128xf32>
    %cst = arith.constant dense<0.000000e+00> : vector<8x128xf32>
    %3 = tpu.matmul %1, %2, %cst {dimension_numbers = #tpu.dot_dimension_numbers<[1], [0], [0], [1], [0, 0, 1, 1], [], []>} : vector<8x32xf32>, vector<32x128xf32>, vector<8x128xf32> -> vector<8x128xf32>
    %c0_4 = arith.constant 0 : index
    %c0_5 = arith.constant 0 : index
    %4 = vector.load %arg3[%c0_4, %c0_5] : memref<32x128xf32, #tpu.memory_space<vmem>>, vector<32x128xf32>
    %cst_6 = arith.constant dense<0.000000e+00> : vector<8x128xf32>
    %5 = tpu.matmul %1, %4, %cst_6 {dimension_numbers = #tpu.dot_dimension_numbers<[1], [0], [0], [1], [0, 0, 1, 1], [], []>} : vector<8x32xf32>, vector<32x128xf32>, vector<8x128xf32> -> vector<8x128xf32>
    %6 = tpu.iota {dimensions = array<i32: 0>} : vector<8x8xi32>
    %7 = tpu.iota {dimensions = array<i32: 1>} : vector<8x8xi32>
    %8 = arith.cmpi sle, %7, %6 : vector<8x8xi32>
    %9 = vector.extract_strided_slice %3 {offsets = [0, 0], sizes = [8, 32], strides = [1, 1]} : vector<8x128xf32> to vector<8x32xf32>
    %10 = vector.extract_strided_slice %5 {offsets = [0, 0], sizes = [8, 32], strides = [1, 1]} : vector<8x128xf32> to vector<8x32xf32>
    %cst_7 = arith.constant dense<0.000000e+00> : vector<8x8xf32>
    %11 = tpu.matmul %9, %10, %cst_7 {dimension_numbers = #tpu.dot_dimension_numbers<[1], [1], [0], [0], [0, 0, 1, 0], [], []>} : vector<8x32xf32>, vector<8x32xf32>, vector<8x8xf32> -> vector<8x8xf32>
    %cst_8 = arith.constant 0.176776692 : f32
    %12 = vector.broadcast %cst_8 : f32 to vector<8x8xf32>
    %13 = arith.mulf %11, %12 : vector<8x8xf32>
    %cst_9 = arith.constant -1.000000e+01 : f32
    %cst_10 = arith.constant 1.000000e+01 : f32
    %14 = vector.broadcast %cst_9 : f32 to vector<8x8xf32>
    %15 = arith.maximumf %14, %13 : vector<8x8xf32>
    %16 = vector.broadcast %cst_10 : f32 to vector<8x8xf32>
    %17 = arith.minimumf %16, %15 : vector<8x8xf32>
    %cst_11 = arith.constant 0xFF800000 : f32
    %18 = vector.broadcast %cst_11 : f32 to vector<8x8xf32>
    %19 = arith.select %8, %17, %18 : vector<8x8xi1>, vector<8x8xf32>
    %cst_12 = arith.constant dense<0xFF800000> : vector<8xf32>
    %20 = vector.multi_reduction <maximumf>, %19, %cst_12 [1] : vector<8x8xf32> to vector<8xf32>
    %21 = vector.shape_cast %20 : vector<8xf32> to vector<8x1xf32>
    %22 = vector.broadcast %21 : vector<8x1xf32> to vector<8x8xf32>
    %23 = arith.subf %19, %22 : vector<8x8xf32>
    %24 = math.exp %23 : vector<8x8xf32>
    %cst_13 = arith.constant dense<0.000000e+00> : vector<8xf32>
    %25 = vector.multi_reduction <add>, %24, %cst_13 [1] : vector<8x8xf32> to vector<8xf32>
    %26 = vector.shape_cast %25 : vector<8xf32> to vector<8x1xf32>
    %27 = tpu.reciprocal %26 {approx = true} : vector<8x1xf32> -> vector<8x1xf32>
    %28 = vector.broadcast %27 : vector<8x1xf32> to vector<8x8xf32>
    %29 = arith.mulf %24, %28 : vector<8x8xf32>
    %cst_14 = arith.constant dense<0.000000e+00> : vector<8x32xf32>
    %30 = tpu.matmul %29, %1, %cst_14 {dimension_numbers = #tpu.dot_dimension_numbers<[1], [0], [0], [1], [0, 0, 1, 1], [], []>} : vector<8x8xf32>, vector<8x32xf32>, vector<8x32xf32> -> vector<8x32xf32>
    %31 = vector.extract_strided_slice %3 {offsets = [0, 32], sizes = [8, 32], strides = [1, 1]} : vector<8x128xf32> to vector<8x32xf32>
    %32 = vector.extract_strided_slice %5 {offsets = [0, 32], sizes = [8, 32], strides = [1, 1]} : vector<8x128xf32> to vector<8x32xf32>
    %cst_15 = arith.constant dense<0.000000e+00> : vector<8x8xf32>
    %33 = tpu.matmul %31, %32, %cst_15 {dimension_numbers = #tpu.dot_dimension_numbers<[1], [1], [0], [0], [0, 0, 1, 0], [], []>} : vector<8x32xf32>, vector<8x32xf32>, vector<8x8xf32> -> vector<8x8xf32>
    %cst_16 = arith.constant 0.176776692 : f32
    %34 = vector.broadcast %cst_16 : f32 to vector<8x8xf32>
    %35 = arith.mulf %33, %34 : vector<8x8xf32>
    %cst_17 = arith.constant -1.000000e+01 : f32
    %cst_18 = arith.constant 1.000000e+01 : f32
    %36 = vector.broadcast %cst_17 : f32 to vector<8x8xf32>
    %37 = arith.maximumf %36, %35 : vector<8x8xf32>
    %38 = vector.broadcast %cst_18 : f32 to vector<8x8xf32>
    %39 = arith.minimumf %38, %37 : vector<8x8xf32>
    %cst_19 = arith.constant 0xFF800000 : f32
    %40 = vector.broadcast %cst_19 : f32 to vector<8x8xf32>
    %41 = arith.select %8, %39, %40 : vector<8x8xi1>, vector<8x8xf32>
    %cst_20 = arith.constant dense<0xFF800000> : vector<8xf32>
    %42 = vector.multi_reduction <maximumf>, %41, %cst_20 [1] : vector<8x8xf32> to vector<8xf32>
    %43 = vector.shape_cast %42 : vector<8xf32> to vector<8x1xf32>
    %44 = vector.broadcast %43 : vector<8x1xf32> to vector<8x8xf32>
    %45 = arith.subf %41, %44 : vector<8x8xf32>
    %46 = math.exp %45 : vector<8x8xf32>
    %cst_21 = arith.constant dense<0.000000e+00> : vector<8xf32>
    %47 = vector.multi_reduction <add>, %46, %cst_21 [1] : vector<8x8xf32> to vector<8xf32>
    %48 = vector.shape_cast %47 : vector<8xf32> to vector<8x1xf32>
    %49 = tpu.reciprocal %48 {approx = true} : vector<8x1xf32> -> vector<8x1xf32>
    %50 = vector.broadcast %49 : vector<8x1xf32> to vector<8x8xf32>
    %51 = arith.mulf %46, %50 : vector<8x8xf32>
    %cst_22 = arith.constant dense<0.000000e+00> : vector<8x32xf32>
    %52 = tpu.matmul %51, %1, %cst_22 {dimension_numbers = #tpu.dot_dimension_numbers<[1], [0], [0], [1], [0, 0, 1, 1], [], []>} : vector<8x8xf32>, vector<8x32xf32>, vector<8x32xf32> -> vector<8x32xf32>
    %53 = vector.extract_strided_slice %3 {offsets = [0, 64], sizes = [8, 32], strides = [1, 1]} : vector<8x128xf32> to vector<8x32xf32>
    %54 = vector.extract_strided_slice %5 {offsets = [0, 64], sizes = [8, 32], strides = [1, 1]} : vector<8x128xf32> to vector<8x32xf32>
    %cst_23 = arith.constant dense<0.000000e+00> : vector<8x8xf32>
    %55 = tpu.matmul %53, %54, %cst_23 {dimension_numbers = #tpu.dot_dimension_numbers<[1], [1], [0], [0], [0, 0, 1, 0], [], []>} : vector<8x32xf32>, vector<8x32xf32>, vector<8x8xf32> -> vector<8x8xf32>
    %cst_24 = arith.constant 0.176776692 : f32
    %56 = vector.broadcast %cst_24 : f32 to vector<8x8xf32>
    %57 = arith.mulf %55, %56 : vector<8x8xf32>
    %cst_25 = arith.constant -1.000000e+01 : f32
    %cst_26 = arith.constant 1.000000e+01 : f32
    %58 = vector.broadcast %cst_25 : f32 to vector<8x8xf32>
    %59 = arith.maximumf %58, %57 : vector<8x8xf32>
    %60 = vector.broadcast %cst_26 : f32 to vector<8x8xf32>
    %61 = arith.minimumf %60, %59 : vector<8x8xf32>
    %cst_27 = arith.constant 0xFF800000 : f32
    %62 = vector.broadcast %cst_27 : f32 to vector<8x8xf32>
    %63 = arith.select %8, %61, %62 : vector<8x8xi1>, vector<8x8xf32>
    %cst_28 = arith.constant dense<0xFF800000> : vector<8xf32>
    %64 = vector.multi_reduction <maximumf>, %63, %cst_28 [1] : vector<8x8xf32> to vector<8xf32>
    %65 = vector.shape_cast %64 : vector<8xf32> to vector<8x1xf32>
    %66 = vector.broadcast %65 : vector<8x1xf32> to vector<8x8xf32>
    %67 = arith.subf %63, %66 : vector<8x8xf32>
    %68 = math.exp %67 : vector<8x8xf32>
    %cst_29 = arith.constant dense<0.000000e+00> : vector<8xf32>
    %69 = vector.multi_reduction <add>, %68, %cst_29 [1] : vector<8x8xf32> to vector<8xf32>
    %70 = vector.shape_cast %69 : vector<8xf32> to vector<8x1xf32>
    %71 = tpu.reciprocal %70 {approx = true} : vector<8x1xf32> -> vector<8x1xf32>
    %72 = vector.broadcast %71 : vector<8x1xf32> to vector<8x8xf32>
    %73 = arith.mulf %68, %72 : vector<8x8xf32>
    %cst_30 = arith.constant dense<0.000000e+00> : vector<8x32xf32>
    %74 = tpu.matmul %73, %1, %cst_30 {dimension_numbers = #tpu.dot_dimension_numbers<[1], [0], [0], [1], [0, 0, 1, 1], [], []>} : vector<8x8xf32>, vector<8x32xf32>, vector<8x32xf32> -> vector<8x32xf32>
    %75 = vector.extract_strided_slice %3 {offsets = [0, 96], sizes = [8, 32], strides = [1, 1]} : vector<8x128xf32> to vector<8x32xf32>
    %76 = vector.extract_strided_slice %5 {offsets = [0, 96], sizes = [8, 32], strides = [1, 1]} : vector<8x128xf32> to vector<8x32xf32>
    %cst_31 = arith.constant dense<0.000000e+00> : vector<8x8xf32>
    %77 = tpu.matmul %75, %76, %cst_31 {dimension_numbers = #tpu.dot_dimension_numbers<[1], [1], [0], [0], [0, 0, 1, 0], [], []>} : vector<8x32xf32>, vector<8x32xf32>, vector<8x8xf32> -> vector<8x8xf32>
    %cst_32 = arith.constant 0.176776692 : f32
    %78 = vector.broadcast %cst_32 : f32 to vector<8x8xf32>
    %79 = arith.mulf %77, %78 : vector<8x8xf32>
    %cst_33 = arith.constant -1.000000e+01 : f32
    %cst_34 = arith.constant 1.000000e+01 : f32
    %80 = vector.broadcast %cst_33 : f32 to vector<8x8xf32>
    %81 = arith.maximumf %80, %79 : vector<8x8xf32>
    %82 = vector.broadcast %cst_34 : f32 to vector<8x8xf32>
    %83 = arith.minimumf %82, %81 : vector<8x8xf32>
    %cst_35 = arith.constant 0xFF800000 : f32
    %84 = vector.broadcast %cst_35 : f32 to vector<8x8xf32>
    %85 = arith.select %8, %83, %84 : vector<8x8xi1>, vector<8x8xf32>
    %cst_36 = arith.constant dense<0xFF800000> : vector<8xf32>
    %86 = vector.multi_reduction <maximumf>, %85, %cst_36 [1] : vector<8x8xf32> to vector<8xf32>
    %87 = vector.shape_cast %86 : vector<8xf32> to vector<8x1xf32>
    %88 = vector.broadcast %87 : vector<8x1xf32> to vector<8x8xf32>
    %89 = arith.subf %85, %88 : vector<8x8xf32>
    %90 = math.exp %89 : vector<8x8xf32>
    %cst_37 = arith.constant dense<0.000000e+00> : vector<8xf32>
    %91 = vector.multi_reduction <add>, %90, %cst_37 [1] : vector<8x8xf32> to vector<8xf32>
    %92 = vector.shape_cast %91 : vector<8xf32> to vector<8x1xf32>
    %93 = tpu.reciprocal %92 {approx = true} : vector<8x1xf32> -> vector<8x1xf32>
    %94 = vector.broadcast %93 : vector<8x1xf32> to vector<8x8xf32>
    %95 = arith.mulf %90, %94 : vector<8x8xf32>
    %cst_38 = arith.constant dense<0.000000e+00> : vector<8x32xf32>
    %96 = tpu.matmul %95, %1, %cst_38 {dimension_numbers = #tpu.dot_dimension_numbers<[1], [0], [0], [1], [0, 0, 1, 1], [], []>} : vector<8x8xf32>, vector<8x32xf32>, vector<8x32xf32> -> vector<8x32xf32>
    %97 = tpu.concatenate %30, %52, %74, %96 in 1 : vector<8x32xf32>, vector<8x32xf32>, vector<8x32xf32>, vector<8x32xf32> -> vector<8x128xf32>
    %c0_39 = arith.constant 0 : index
    %c0_40 = arith.constant 0 : index
    %98 = vector.load %arg4[%c0_39, %c0_40] : memref<128x32xf32, #tpu.memory_space<vmem>>, vector<128x32xf32>
    %cst_41 = arith.constant dense<0.000000e+00> : vector<8x32xf32>
    %99 = tpu.matmul %97, %98, %cst_41 {dimension_numbers = #tpu.dot_dimension_numbers<[1], [0], [0], [1], [0, 0, 1, 1], [], []>} : vector<8x128xf32>, vector<128x32xf32>, vector<8x32xf32> -> vector<8x32xf32>
    %c0_42 = arith.constant 0 : index
    %c0_43 = arith.constant 0 : index
    %c0_44 = arith.constant 0 : index
    %100 = vector.load %arg5[%c0_42, %c0_43, %c0_44] : memref<1x8x32xf32, #tpu.memory_space<vmem>>, vector<1x8x32xf32>
    %101 = vector.shape_cast %100 : vector<1x8x32xf32> to vector<8x32xf32>
    %102 = vector.shape_cast %99 : vector<8x32xf32> to vector<1x8x32xf32>
    tpu.vector_store %arg5[%c0_42, %c0_43, %c0_44], %102 {strides = array<i32>} : memref<1x8x32xf32, #tpu.memory_space<vmem>>, vector<1x8x32xf32>,
    return
  }
  func.func @transform_0(%arg0: i32) -> (i32, i32, i32) {
    %c0_i32 = arith.constant 0 : i32
    %c0_i32_0 = arith.constant 0 : i32
    %c0_i32_1 = arith.constant 0 : i32
    return %arg0, %c0_i32, %c0_i32_0 : i32, i32, i32
  }
  func.func @transform_1(%arg0: i32) -> (i32, i32) {
    %c0_i32 = arith.constant 0 : i32
    %c0_i32_0 = arith.constant 0 : i32
    %c0_i32_1 = arith.constant 0 : i32
    return %c0_i32, %c0_i32_0 : i32, i32
  }
  func.func @transform_2(%arg0: i32) -> (i32, i32) {
    %c0_i32 = arith.constant 0 : i32
    %c0_i32_0 = arith.constant 0 : i32
    %c0_i32_1 = arith.constant 0 : i32
    return %c0_i32, %c0_i32_0 : i32, i32
  }
  func.func @transform_3(%arg0: i32) -> (i32, i32) {
    %c0_i32 = arith.constant 0 : i32
    %c0_i32_0 = arith.constant 0 : i32
    %c0_i32_1 = arith.constant 0 : i32
    return %c0_i32, %c0_i32_0 : i32, i32
  }
  func.func @transform_4(%arg0: i32) -> (i32, i32, i32) {
    %c0_i32 = arith.constant 0 : i32
    %c0_i32_0 = arith.constant 0 : i32
    %c0_i32_1 = arith.constant 0 : i32
    return %arg0, %c0_i32, %c0_i32_0 : i32, i32, i32
  }
}

</mosaic_0001>

<bundles_post_ra>
// kernel: tpu_custom_call.1
= control target key start
LH: loop header
LB: loop body
LE: loop exit
PB: predicated region body
PF: predicated region fallthrough
CT: control target
= control target key end

     0   :  { %9 = vsyncpa [#allocation3], 0  ;;  %s1828_s0 = inlined_call_operand.vmem [shape: f32[2,8,32], index: 0, kind: input, shape index: {}]   ;;  %s1829_s1 = inlined_call_operand.vmem [shape: f32[32,128], index: 1, kind: input, shape index: {}]   ;;  %s1830_s2 = inlined_call_operand.vmem [shape: f32[32,128], index: 2, kind: input, shape index: {}]   ;;  %s1831_s3 = inlined_call_operand.vmem [shape: f32[128,32], index: 3, kind: input, shape index: {}]   ;;  %s1832_s4 = inlined_call_operand.hbm [shape: f32[2,8,32], index: 4, kind: output, shape index: {}]  }
   0x1   :  { %11 = vsyncpa [#allocation3 + $0x1], 0  ;;  %s1552_s15 = smov 0   ;;  %s1554_s16 = smov 0  }
   0x2   :  { %s1556_s17 = smov 0   ;;  %s1558_s18 = smov 0  }
   0x3 LB: > { %s1573_s19 = sadd.s32 4294967295, %s1518_s18   ;;  %s1191_s20 = sadd.s32 4294967294, %s1518_s18   ;;  %s1518_s18 = sphi %s1558_s18, %s1838_s18   ;;  %s1514_s17 = sphi %s1556_s17, %s1837_s17   ;;  %s1510_s16 = sphi %s1554_s16, %s1836_s16   ;;  %s1506_s15 = sphi %s1552_s15, %s1835_s15  }
   0x4   : > { %s1577_s21 = sadd.s32 1, %s1518_s18   ;;  %s113_s22 = sadd.s32 1, %s1514_s17 }
   0x5   : > { %s110_s23 = ssub.s32 %s1518_s18, %s1577_s21  ;;  %p123_p0 = scmp.ne.s32.totalorder %s1514_s17, %s1510_s16 }
   0x6   : > { %p111_p1 = scmp.eq.s32.totalorder %s110_s23, 0  ;;  %p124_p2 = scmp.eq.s32.totalorder %s1573_s19, 1 }
   0x7   : > { %p129_p3 = scmp.ne.s32.totalorder %s1510_s16, %s1506_s15  ;;  %p130_p4 = scmp.eq.s32.totalorder %s1191_s20, 1 }
   0x8   : > { %s1588_s24 = scalar_select %p111_p1, %s1514_s17, %s113_s22  }
   0x9   : > { %p1590_p5 = por %p124_p2, %p123_p0  ;;  %p1594_p6 = por %p130_p4, %p129_p3 }
   0xa   : > { %p1194_p7 = scmp.ge.s32.totalorder %s1518_s18, 1  ;;  %p164_p8 = scmp.lt.s32.totalorder %s1518_s18, 3 }
   0xc   : > { %p165_p9 = pnand %p1194_p7, %p164_p8 }
   0xd   : > { %v194_v0 = vld [vmem:[%s1829_s1] sm:$0xff] (!%p165_p9)  ;;  %v195_v1 = vld [vmem:[%s1829_s1 + $0x8] sm:$0xff] (!%p165_p9)  ;;  %v196_v2 = vld [vmem:[%s1829_s1 + $0x10] sm:$0xff] (!%p165_p9)  ;;  %v1520_v3 = vmov (!%p165_p9), 0.0|0.0   ;;  %vm1521_vm0 = vmmov (!%p165_p9), 0   ;;  %v1522_v6 = vmov (!%p165_p9), 0.0   ;;  %v346_v19 = vlaneseq (!%p165_p9) }
   0xe   : > { %168 = sbr.rel (%p165_p9) target bundleno = 1877 (0x755), region = 36  ;;  %1359 = vmatprep.subr.bf16.mxu1 (!%p165_p9), %v1520_v3  ;;  %v1360_v4 = vpack.c.bf16 (!%p165_p9), %v195_v1, %v194_v0  ;;  %v197_v5 = vld [vmem:[%s1829_s1 + $0x18] sm:$0xff] (!%p165_p9)  ;;  %1270 = vmatprep.mubr.msk.f32.mxu1 (!%p165_p9), %vm1521_vm0, %v1522_v6  ;;  %p189_p10 = scmp.lt.s32.totalorder (!%p165_p9), %s1573_s19, 1  ;;  %v272_v8 = vld [vmem:[%s1830_s2] sm:$0xff] (!%p165_p9)  ;;  %v273_v9 = vld [vmem:[%s1830_s2 + $0x8] sm:$0xff] (!%p165_p9)  ;;  %vm198_vm1 = vcmask (!%p165_p9), 261120  }
   0xf   : > { %1304 = vmatprep.subr.mxu0 (!%p165_p9), %v1522_v6  ;;  %1306 = vmatprep.mubr.msk.f32.mxu0 (!%p165_p9), %vm1521_vm0, %v1522_v6  ;;  %v1363_v7 = vpack.c.bf16 (!%p165_p9), %v197_v5, %v196_v2  ;;  %v1366_v11 = vpack.c.bf16 (!%p165_p9), %v273_v9, %v272_v8  ;;  %v274_v12 = vld [vmem:[%s1830_s2 + $0x10] sm:$0xff] (!%p165_p9)  ;;  %v275_v13 = vld [vmem:[%s1830_s2 + $0x18] sm:$0xff] (!%p165_p9)  ;;  %s1523_s5 = smov (!%p165_p9), 96   ;;  %s1524_s6 = smov (!%p165_p9), 64   ;;  %v1661_v20 = vshrl.u32 (!%p165_p9), %v346_v19, 7  ;;  %v1663_v21 = vand.u32 (!%p165_p9), 127, %v346_v19 }
  0x10   : > { %1361 = vmatpush3.bf16.msra.mxu1 (!%p165_p9), %v1360_v4  ;;  %v1369_v14 = vpack.c.bf16 (!%p165_p9), %v275_v13, %v274_v12  ;;  %s1525_s7 = smov (!%p165_p9), 32   ;;  %vm431_vm3 = vcmask (!%p165_p9), 64512   ;;  %vm1027_vm4 = vcmask (!%p165_p9), 523264   ;;  %vm1029_vm5 = vcmask (!%p165_p9), 785408   ;;  %s1216_s12 = sshll.u32 (!%p165_p9), %s1573_s19, 7 }
  0x11   : > { %1362 = vmatprep.subr.bf16.mxu1 (!%p165_p9), %v1520_v3  ;;  %vm350_vm2 = vcmp.le.s32.totalorder (!%p165_p9), %v1663_v21, %v1661_v20  ;;  %s1785_s22 = scalar_lea.hbm (!%p165_p9), %s1832_s4, %s1216_s12 }
  0x14   : > { %1364 = vmatpush3.bf16.msra.mxu1 (!%p165_p9), %v1363_v7 }
  0x15   : > { %s190_s9 = scalar_select %p189_p10, %s1573_s19, 1  ;;  %1365 = vmatprep.subr.bf16.mxu1 %v1520_v3 }
  0x16   : > { %s1526_s19 = smov [#allocation2]  }
  0x17   : > { %s1196_s14 = sshll.u32 %s190_s9, 3  ;;  %s1460_s28 = sshll.u32 %s1526_s19, 4  ;;  %s1461_s28 = int_to_ptr.vmem [resolvable:$false] %s1460_s28 }
  0x18   : > { %s192_s23 = scalar_lea.vmem %s1828_s0, %s1196_s14  ;;  %s1462_s29 = scalar_lea.vmem %s1461_s28, 256 }
  0x19   : > { %v1630_v10 = vld [vmem:[%s192_s23] sm:$0xff] }
  0x1a   : > { %1271 = vmatmul.mubr.msk.f32.vlgmr.msra.gmra.mrb[0].mxu1 %vm198_vm1, %v1630_v10 }
  0x1b   : > { %1367 = vmatpush3.bf16.msra.mxu1 %v1366_v11  ;;  %1281 = vmatprep.mubr.msk.f32.mxu1 %vm1521_vm0, %v1522_v6 }
  0x1c   : > { %1368 = vmatprep.subr.bf16.mxu1 %v1520_v3 }
  0x1f   : > { %1370 = vmatpush3.bf16.msra.mxu1 %v1369_v14 }
  0x20   : > { %1284 = vmatprep.subr.mxu1 %v1522_v6 }
  0x22   : > { %1282 = vmatmul.mubr.msk.f32.vlgmr.msra.gmra.mrb[2].mxu1 %vm198_vm1, %v1630_v10 }
  0x23   : > { %1286 = vmatprep.mubr.msk.f32.mxu1 %vm1521_vm0, %v1522_v6 }
  0xed   : > { %v268_v15 = vpop.f32.mrb[0].mxu1 }
  0xee   : > { %v1272_v16 = vpop.f32.mrb[1].mxu1 }
  0xf5   : > { %v342_v17 = vpop.f32.mrb[2].mxu1 }
  0xf6   : > { %518 = vrot.lane.b32.xlu1 %v342_v17, %s1523_s5  ;;  %v1283_v18 = vpop.f32.mrb[3].mxu1  ;;  %1285 = vmatpush3.xpose.msk.msra.mxu1 %vm198_vm1, %v342_v17 }
  0xf7   : > { %1289 = vmatprep.subr.mxu1 %v1522_v6 }
  0xf9   : > { %1287 = vmatmul.mubr.msk.f32.vlgmr.msra.gmra.mrb[4].mxu1 %vm198_vm1, %v268_v15 }
  0xfa   : > { %516 = vrot.lane.b32.xlu1 %v268_v15, %s1523_s5  ;;  %1290 = vmatpush3.msra.mxu1 %v1630_v10 }
  0xfb   : > { %1291 = vmatprep.mubr.msk.f32.mxu1 %vm1521_vm0, %v1522_v6  ;;  %1294 = vmatprep.subr.mxu1 %v1522_v6 }
  0xfe   : > { %682 = vrot.lane.b32.xlu1 %v268_v15, %s1524_s6 }
 0x102   : > { %850 = vrot.lane.b32.xlu1 %v342_v17, %s1525_s7 }
 0x106   : > { %848 = vrot.lane.b32.xlu1 %v268_v15, %s1525_s7 }
 0x168   : > { %v519_v33 = vpop.permute.xlu1 %518 }
 0x16c   : > { %v517_v34 = vpop.permute.xlu1 %516 }
 0x170   : > { %v683_v35 = vpop.permute.xlu1 %682 }
 0x174   : > { %v851_v38 = vpop.permute.xlu1 %850 }
 0x178   : > { %v849_v40 = vpop.permute.xlu1 %848 }
 0x1cc   : > { %v423_v22 = vpop.f32.mrb[4].mxu1 }
 0x1cd   : > { %v427_v23 = vmul.f32 0.17677669, %v423_v22  ;;  %v1288_v24 = vpop.f32.mrb[5].mxu1 }
 0x1cf   : > { %v1201_v25 = vclamps-f32 %v427_v23, 10.0 }
 0x1d1   : > { %v430_v26 = vsel %vm350_vm2, %v1201_v25, -inf  ;;  %v1031_v25 = vld [vmem:[%s1831_s3] sm:$0xff] }
 0x1d2   : > { %v432_v27 = vsel %vm431_vm3, %v430_v26, -inf }
 0x1d3   : > { %433 = vmax.xlane.f32.xlu0 %v432_v27  ;;  %v1033_v27 = vld [vmem:[%s1831_s3 + $0x10] sm:$0xff] }
 0x260   : > { %v434_v28 = vpop.xlane.xlu0 %433 }
 0x261   : > { %v435_v29 = vsub.f32 %v430_v26, %v434_v28  ;;  %v1032_v26 = vld [vmem:[%s1831_s3 + $0x8] sm:$0xff] }
 0x262   : > { %v1372_v28 = vpack.c.bf16 %v1032_v26, %v1031_v25 }
 0x263   : > { %v436_v30 = vmul.f32 1.442695, %v435_v29  ;;  %v1035_v29 = vld [vmem:[%s1831_s3 + $0x20] sm:$0xff] }
 0x265   : > { %1440 = vpow2.f32 %v436_v30  ;;  %v1036_v30 = vld [vmem:[%s1831_s3 + $0x28] sm:$0xff] }
 0x26f   : > { %v1441_v31 = vpop.eup %1440 }
 0x270   : > { %v438_v32 = vsel %vm431_vm3, %v1441_v31, 0.0 }
 0x271   : > { %439 = vadd.xlane.f32.xlu0 %v438_v32  ;;  %v1037_v32 = vld [vmem:[%s1831_s3 + $0x30] sm:$0xff] }
 0x287   : > { %684 = vrot.lane.b32.xlu0 %v342_v17, %s1524_s6 }
 0x2fe   : > { %v440_v36 = vpop.xlane.xlu0 %439 }
 0x2ff   : > { %1442 = vrcp.f32 %v440_v36  ;;  %v1040_v36 = vld [vmem:[%s1831_s3 + $0x48] sm:$0xff] }
 0x302   : > { %v685_v37 = vpop.permute.xlu0 %684 }
 0x303   : > { %1305 = vmatpush3.xpose.msk.msra.mxu0 %vm198_vm1, %v685_v37 }
 0x304   : > { %1314 = vmatprep.subr.mxu0 %v1522_v6 }
 0x306   : > { %1307 = vmatmul.mubr.msk.f32.vlgmr.msra.gmra.mrb[0].mxu0 %vm198_vm1, %v683_v35  ;;  %v1039_v35 = vld [vmem:[%s1831_s3 + $0x40] sm:$0xff] }
 0x307   : > { %1315 = vmatpush3.xpose.msk.msra.mxu0 %vm198_vm1, %v851_v38  ;;  %1316 = vmatprep.mubr.msk.f32.mxu0 %vm1521_vm0, %v1522_v6  ;;  %v1384_v37 = vpack.c.bf16 %v1040_v36, %v1039_v35  ;;  %v1041_v38 = vld [vmem:[%s1831_s3 + $0x50] sm:$0xff] }
 0x308   : > { %1371 = vmatprep.subr.bf16.mxu0 %v1520_v3 }
 0x309   : > { %v1443_v39 = vpop.eup %1442 }
 0x30a   : > { %v442_v41 = vmul.f32 %v1443_v39, %v1441_v31  ;;  %1317 = vmatmul.mubr.msk.f32.vlgmr.msra.gmra.mrb[2].mxu0 %vm198_vm1, %v849_v40  ;;  %v1378_v31 = vpack.c.bf16 %v1036_v30, %v1035_v29  ;;  %v1042_v39 = vld [vmem:[%s1831_s3 + $0x58] sm:$0xff] }
 0x30b   : > { %1356 = vmatprep.mubr.msk.f32.mxu0 %vm1521_vm0, %v1522_v6  ;;  %1373 = vmatpush3.bf16.msra.mxu0 %v1372_v28  ;;  %v1387_v40 = vpack.c.bf16 %v1042_v39, %v1041_v38 }
 0x30c   : > { %1292 = vmatmul.mubr.msk.f32.vlgmr.msra.gmra.mrb[6].mxu1 %vm431_vm3, %v442_v41  ;;  %1374 = vmatprep.subr.bf16.mxu0 %v1520_v3  ;;  %v1043_v41 = vld [vmem:[%s1831_s3 + $0x60] sm:$0xff] }
 0x30d   : > { %1295 = vmatpush3.xpose.msk.msra.mxu1 %vm198_vm1, %v519_v33  ;;  %1296 = vmatprep.mubr.msk.f32.mxu1 %vm1521_vm0, %v1522_v6  ;;  %v1038_v33 = vld [vmem:[%s1831_s3 + $0x38] sm:$0xff] }
 0x30e   : > { %1299 = vmatprep.subr.mxu1 %v1522_v6 }
 0x310   : > { %1297 = vmatmul.mubr.msk.f32.vlgmr.msra.gmra.mrb[8].mxu1 %vm198_vm1, %v517_v34  ;;  %v1381_v34 = vpack.c.bf16 %v1038_v33, %v1037_v32 }
 0x311   : > { %1300 = vmatpush3.msra.mxu1 %v1630_v10  ;;  %1301 = vmatprep.mubr.msk.f32.mxu1 %vm1521_vm0, %v1522_v6 }
 0x312   : > { %1309 = vmatprep.subr.mxu1 %v1522_v6 }
 0x3d9   : > { %v756_v42 = vpop.f32.mrb[0].mxu0 }
 0x3da   : > { %v760_v43 = vmul.f32 0.17677669, %v756_v42  ;;  %v1308_v44 = vpop.f32.mrb[1].mxu0  ;;  %v1044_v42 = vld [vmem:[%s1831_s3 + $0x68] sm:$0xff] }
 0x3db   : > { %v1045_v44 = vld [vmem:[%s1831_s3 + $0x70] sm:$0xff] }
 0x3dc   : > { %v1209_v45 = vclamps-f32 %v760_v43, 10.0  ;;  %v1390_v43 = vpack.c.bf16 %v1044_v42, %v1043_v41 }
 0x3dd   : > { %v922_v46 = vpop.f32.mrb[2].mxu0 }
 0x3de   : > { %v1318_v47 = vpop.f32.mrb[3].mxu0  ;;  %v763_v48 = vsel %vm350_vm2, %v1209_v45, -inf  ;;  %v926_v52 = vmul.f32 0.17677669, %v922_v46  ;;  %v1046_v45 = vld [vmem:[%s1831_s3 + $0x78] sm:$0xff] }
 0x3df   : > { %v1696_v49 = vpop.f32.mrb[6].mxu1  ;;  %v764_v50 = vsel %vm431_vm3, %v763_v48, -inf  ;;  %v1393_v46 = vpack.c.bf16 %v1046_v45, %v1045_v44 }
 0x3e0   : > { %765 = vmax.xlane.f32.xlu0 %v764_v50  ;;  %v1293_v51 = vpop.f32.mrb[7].mxu1  ;;  %v1213_v56 = vclamps-f32 %v926_v52, 10.0 }
 0x3e2   : > { %v929_v60 = vsel %vm350_vm2, %v1213_v56, -inf }
 0x3e3   : > { %v590_v53 = vpop.f32.mrb[8].mxu1  ;;  %v930_v61 = vsel %vm431_vm3, %v929_v60, -inf }
 0x3e4   : > { %v594_v54 = vmul.f32 0.17677669, %v590_v53  ;;  %v1298_v55 = vpop.f32.mrb[9].mxu1 }
 0x3e6   : > { %v1205_v57 = vclamps-f32 %v594_v54, 10.0 }
 0x3e8   : > { %v597_v58 = vsel %vm350_vm2, %v1205_v57, -inf }
 0x3e9   : > { %v598_v59 = vsel %vm431_vm3, %v597_v58, -inf }
 0x3ea   : > { %599 = vmax.xlane.f32.xlu1 %v598_v59 }
 0x3ee   : > { %931 = vmax.xlane.f32.xlu1 %v930_v61 }
 0x46d   : > { %v766_v62 = vpop.xlane.xlu0 %765 }
 0x46e   : > { %v767_v63 = vsub.f32 %v763_v48, %v766_v62 }
 0x470   : > { %v768_v0 = vmul.f32 1.442695, %v767_v63 }
 0x472   : > { %1444 = vpow2.f32 %v768_v0 }
 0x477   : > { %v600_v1 = vpop.xlane.xlu1 %599 }
 0x478   : > { %v601_v2 = vsub.f32 %v597_v58, %v600_v1 }
 0x47a   : > { %v602_v4 = vmul.f32 1.442695, %v601_v2 }
 0x47b   : > { %v932_v5 = vpop.xlane.xlu1 %931 }
 0x47c   : > { %v1445_v7 = vpop.eup %1444  ;;  %1446 = vpow2.f32 %v602_v4  ;;  %v933_v8 = vsub.f32 %v929_v60, %v932_v5 }
 0x47d   : > { %v770_v9 = vsel %vm431_vm3, %v1445_v7, 0.0 }
 0x47e   : > { %v934_v11 = vmul.f32 1.442695, %v933_v8  ;;  %771 = vadd.xlane.f32.xlu0 %v770_v9 }
 0x480   : > { %1448 = vpow2.f32 %v934_v11 }
 0x486   : > { %v1447_v12 = vpop.eup %1446 }
 0x487   : > { %v604_v13 = vsel %vm431_vm3, %v1447_v12, 0.0 }
 0x488   : > { %605 = vadd.xlane.f32.xlu1 %v604_v13 }
 0x48a   : > { %v1449_v14 = vpop.eup %1448 }
 0x48b   : > { %v936_v15 = vsel %vm431_vm3, %v1449_v14, 0.0 }
 0x48c   : > { %937 = vadd.xlane.f32.xlu1 %v936_v15 }
 0x50b   : > { %v772_v16 = vpop.xlane.xlu0 %771 }
 0x515   : > { %v606_v17 = vpop.xlane.xlu1 %605 }
 0x516   : > { %1450 = vrcp.f32 %v606_v17 }
 0x517   : > { %1452 = vrcp.f32 %v772_v16 }
 0x519   : > { %v938_v18 = vpop.xlane.xlu1 %937 }
 0x51a   : > { %1454 = vrcp.f32 %v938_v18 }
 0x520   : > { %v1451_v19 = vpop.eup %1450 }
 0x521   : > { %v608_v20 = vmul.f32 %v1451_v19, %v1447_v12  ;;  %v1453_v21 = vpop.eup %1452 }
 0x522   : > { %v774_v22 = vmul.f32 %v1453_v21, %v1445_v7 }
 0x523   : > { %1302 = vmatmul.mubr.msk.f32.vlgmr.msra.gmra.mrb[10].mxu1 %vm431_vm3, %v608_v20 }
 0x524   : > { %1310 = vmatpush3.msra.mxu1 %v1630_v10  ;;  %1311 = vmatprep.mubr.msk.f32.mxu1 %vm1521_vm0, %v1522_v6  ;;  %v1455_v23 = vpop.eup %1454 }
 0x525   : > { %1319 = vmatprep.subr.mxu1 %v1522_v6  ;;  %v940_v24 = vmul.f32 %v1455_v23, %v1449_v14 }
 0x527   : > { %1312 = vmatmul.mubr.msk.f32.vlgmr.msra.gmra.mrb[12].mxu1 %vm431_vm3, %v774_v22 }
 0x528   : > { %1320 = vmatpush3.msra.mxu1 %v1630_v10  ;;  %1321 = vmatprep.mubr.msk.f32.mxu1 %vm1521_vm0, %v1522_v6  ;;  %v1034_v6 = vld [vmem:[%s1831_s3 + $0x18] sm:$0xff] }
 0x529   : > { %v1375_v10 = vpack.c.bf16 %v1034_v6, %v1033_v27 }
 0x52b   : > { %1322 = vmatmul.mubr.msk.f32.vlgmr.msra.gmra.mrb[14].mxu1 %vm431_vm3, %v940_v24  ;;  %1376 = vmatpush3.bf16.msra.mxu0 %v1375_v10 }
 0x52c   : > { %1377 = vmatprep.subr.bf16.mxu0 %v1520_v3 }
 0x52f   : > { %1379 = vmatpush3.bf16.msra.mxu0 %v1378_v31 }
 0x530   : > { %1380 = vmatprep.subr.bf16.mxu0 %v1520_v3 }
 0x533   : > { %1382 = vmatpush3.bf16.msra.mxu0 %v1381_v34 }
 0x534   : > { %1383 = vmatprep.subr.bf16.mxu0 %v1520_v3 }
 0x537   : > { %1385 = vmatpush3.bf16.msra.mxu0 %v1384_v37 }
 0x538   : > { %1386 = vmatprep.subr.bf16.mxu0 %v1520_v3 }
 0x53b   : > { %1388 = vmatpush3.bf16.msra.mxu0 %v1387_v40 }
 0x53c   : > { %1389 = vmatprep.subr.bf16.mxu0 %v1520_v3 }
 0x53f   : > { %1391 = vmatpush3.bf16.msra.mxu0 %v1390_v43 }
 0x540   : > { %1392 = vmatprep.subr.bf16.mxu0 %v1520_v3 }
 0x543   : > { %1394 = vmatpush3.bf16.msra.mxu0 %v1393_v46 }
 0x5f6   : > { %v678_v47 = vpop.f32.mrb[10].mxu1 }
 0x5f7   : > { %1015 = vrot.lane.b32.xlu0 %v678_v47, %s1525_s7  ;;  %v1303_v48 = vpop.f32.mrb[11].mxu1  ;;  %s186_s7 = sand.u32 1, %s1510_s16  }
 0x5f8   : > { %s1119_s23 = scalar_lea.sflag [#allocation3], %s186_s7 }
 0x5fa   : > { %v844_v50 = vpop.f32.mrb[12].mxu1 }
 0x5fb   : > { %1019 = vrot.lane.b32.xlu1 %v844_v50, %s1524_s6  ;;  %v1313_v3 = vpop.f32.mrb[13].mxu1  ;;  %s1195_s6 = sshll.u32 %s186_s7, 3 }
 0x5fc   : > { %s188_s13 = scalar_lea.vmem [#allocation2], %s1195_s6 }
 0x5fd   : > { %s1132_s14 = sshll.u32 %s188_s13, 4  ;;  %s1787_s14 = int_to_ptr.vmem [resolvable:$true] %s1132_s14 }
 0x5fe   : > { %v1010_v51 = vpop.f32.mrb[14].mxu1  ;;  %s1456_s27 = scalar_lea.vmem %s1787_s14, 128  ;;  %p1463_p0 = scmp.lt.s32.totalorder %s1787_s14, %s1461_s28 }
 0x5ff   : > { %1023 = vrot.lane.b32.xlu1 %v1010_v51, %s1523_s5  ;;  %v1323_v52 = vpop.f32.mrb[15].mxu1  ;;  %p1457_p11 = scmp.ne.s32.totalorder %s1787_s14, %s1456_s27  ;;  %p1464_p1 = scmp.lt.s32.totalorder %s1462_s29, %s1456_s27 }
 0x601   : > { %p1458_p12 = pnand %p1457_p11, %p1590_p5  ;;  %p1465_p2 = por %p1464_p1, %p1463_p0 }
 0x603   : > { %p1459_p13 = pneg %p1458_p12 }
 0x605   : > { %p1466_p3 = pnand %p1465_p2, %p1459_p13 }
 0x669   : > { %v1016_v53 = vpop.permute.xlu0 %1015 }
 0x66a   : > { %v1026_v55 = vsel %vm198_vm1, %v1696_v49, %v1016_v53 }
 0x66d   : > { %v1020_v54 = vpop.permute.xlu1 %1019 }
 0x66e   : > { %v1028_v56 = vsel %vm1027_vm4, %v1026_v55, %v1020_v54 }
 0x671   : > { %v1024_v57 = vpop.permute.xlu1 %1023 }
 0x672   : > { %v1030_v58 = vsel %vm1029_vm5, %v1028_v56, %v1024_v57 }
 0x673   : > { %1357 = vmatmul.mubr.f32.vlgmr.msra.gmra.mrb[4].mxu0 %v1030_v58 }
 0x746   : > { %v1113_v49 = vpop.f32.mrb[4].mxu0 }
 0x747   : > { %1117 = vst.msk [vmem:[%s188_s13] sm:$0xff] %vm198_vm1, %v1113_v49  ;;  %v1358_v59 = vpop.f32.mrb[5].mxu0 }
 0x748   : > { %1469 = shalt.err (!%p1466_p3)
}
 0x749   : > { %s1470_s30 = scalar_lea.hbm %s1785_s22, 128  ;;  %s1474_s10 = scalar_lea.hbm %s1832_s4, 256 }
 0x74a   : > { %p1471_p4 = scmp.ne.s32.totalorder %s1785_s22, %s1470_s30  ;;  %p1475_p9 = scmp.lt.u32.totalorder %s1785_s22, %s1832_s4 }
 0x74b   : > { %p1476_p10 = scmp.lt.u32.totalorder %s1474_s10, %s1470_s30  ;;  %p1478_p12 = scmp.lt.u32.totalorder %s1470_s30, %s1785_s22 }
 0x74c   : > { %p1472_p7 = pnand %p1471_p4, %p1590_p5 }
 0x74d   : > { %p1477_p11 = por %p1476_p10, %p1475_p9 }
 0x74e   : > { %p1473_p8 = pneg %p1472_p7 }
 0x74f   : > { %p1479_p13 = por %p1478_p12, %p1477_p11 }
 0x751   : > { %p1480_p0 = pnand %p1479_p13, %p1473_p8 }
 0x753   : > { %1483 = shalt.err (!%p1480_p0)
}
 0x754   : > { %1395 = dma.vmem_to_hbm [thread:$0]  (%p1590_p5), %s1787_s14, 128, %s1785_s22, %s1119_s23  }
 0x755 PF: > { %p1401_p1 = scmp.ge.s32.totalorder %s1518_s18, 2  ;;  %s1144_s6 = sand.u32 1, %s1506_s15  }
 0x756   : > { %s1145_s12 = scalar_lea.sflag [#allocation3], %s1144_s6 }
 0x757   : > { %p1398_p2 = pnand %p1401_p1, %p1594_p6 }
 0x759   : > { %1501 = dma.done.wait (!%p1398_p2), %s1145_s12, 128  }
 0x75a   : > { %1503 = vsyncadd (!%p1398_p2), %s1145_s12, 4294967168  ;;  %p14_p3 = scmp.ge.s32.totalorder %s1577_s21, 4   ;;  %s1835_s15 = smov %s1510_s16 }
 0x75b   : > { %s1836_s16 = smov %s1514_s17  ;;  %s1837_s17 = smov %s1588_s24 }
 0x75c   : > { %s1838_s18 = smov %s1577_s21  ;;  %16 = sbr.rel (!%p14_p3) target bundleno = 3 (0x3), region = 71 }
 0x763   :  { %1150 = vsyncpa [#allocation3], 1 }
 0x764   :  { %1152 = vsyncpa [#allocation3 + $0x1], 1 }

</bundles_post_ra>
